<compile_context>
chip_gen: v5e
topology: v5e:2x2
jax: 0.10.0
libtpu: 0.0.40
codegen_flags: <defaults>
</compile_context>

<pallas_src>
import jax
import jax.numpy as jnp
from jax.experimental import pallas as pl
from jax.experimental.pallas import tpu as pltpu


def _shift_kernel(s_ref, x_ref, p_ref, o_ref):
    # s_ref: (1,) f32 in SMEM.  x_ref/o_ref: (tn, tf) tile.  p_ref: (p_rows, tf)
    # where p_rows is 1 (plain sublane broadcast) or exactly tn (packed
    # small-batch path).  Single fused VPU multiply-add.
    o_ref[...] = (x_ref[...] + s_ref[0] * p_ref[...]).astype(o_ref.dtype)


def _round_up(v, m):
    return -(-v // m) * m


def data_shift_adversary(x, parameter, strength):
    """x: (N, *shape); parameter: (1, *shape); strength: python/JAX scalar."""
    n = x.shape[0]
    shape = tuple(x.shape[1:])
    assert parameter.shape == (1,) + shape, (parameter.shape, shape)

    feat = 1
    for d in shape:
        feat *= d
    feat = max(feat, 1)

    itemsize = jnp.dtype(x.dtype).itemsize
    # Sublanes per vreg for this dtype: f32 -> 8, bf16 -> 16, int8/fp8 -> 32.
    pack = max(8, 32 // max(itemsize, 1))

    # ---------------- layout glue: free reshapes only (no pad, no copy) -------
    x2 = x.reshape(n, feat)
    p2 = parameter.reshape(1, feat)
    rows, feat_e, p_rows = n, feat, 1
    folded = False
    if n < pack and feat >= pack and feat % pack == 0:
        # Fold `pack` feature chunks per row onto sublanes so every vreg is full.
        rows, feat_e, p_rows = n * pack, feat // pack, pack
        x2 = x2.reshape(rows, feat_e)
        p2 = p2.reshape(p_rows, feat_e)
        folded = True

    # ---------------- generation-aware budgets --------------------------------
    try:
        vmem_cap = int(pltpu.get_tpu_info().vmem_capacity_bytes)
    except Exception:
        vmem_cap = 64 * 1024 * 1024  # conservative fallback (v7x-sized VMEM)
    if vmem_cap <= 64 * 1024 * 1024:
        # v7x-class: half the VMEM, ~2.3x the HBM bandwidth.
        block_budget = 4 * 1024 * 1024
        vmem_limit = 32 * 1024 * 1024
    else:
        # v5e / v6e: 128 MiB VMEM -> bigger blocks, fewer per-step overheads.
        block_budget = 8 * 1024 * 1024
        vmem_limit = 64 * 1024 * 1024
    # NOTE: on v5e one could additionally sweep pipeline_mode=pl.Buffered(3)
    # on the x/out specs; left at the default double-buffering here.

    row_bytes = feat_e * itemsize
    full_width_ok = pack * row_bytes <= block_budget

    # ---------------- tile / grid selection -----------------------------------
    if full_width_ok:
        # Full-feature-width blocks: fully contiguous HBM DMA per block.
        tf = feat_e
        if folded:
            tn = pack                      # MUST equal the parameter repeat period
        elif rows <= pack:
            tn = rows                      # full-extent block (may be < 8 rows)
        else:
            tn = max(pack, (block_budget // row_bytes) // pack * pack)
            tn = min(tn, _round_up(rows, pack))
            # Keep >= 2 row tiles so both v7x TensorCores get work, as long as
            # each block stays >= ~1 MiB.
            if -(-rows // tn) == 1:
                half = _round_up(-(-rows // 2), pack)
                if half < tn and half * row_bytes >= (1 << 20):
                    tn = half
        if folded:
            assert tn == p_rows, "packed path requires row tile == param period"
        grid = (-(-rows // tn),)
        in_specs = [
            pl.BlockSpec(memory_space=pltpu.MemorySpace.SMEM),   # strength scalar
            pl.BlockSpec((tn, tf), lambda i: (i, 0)),            # x tile
            # Constant block index: parameter DMA'd into VMEM once, then resident.
            pl.BlockSpec((p_rows, tf), lambda i: (0, 0)),
        ]
        out_specs = pl.BlockSpec((tn, tf), lambda i: (i, 0))
        dim_sems = ("parallel",)
    else:
        # Huge per-row feature count: split lanes into large 128-multiples.
        tn = pack if (folded or rows >= pack) else rows
        if folded:
            assert tn == p_rows, "packed path requires row tile == param period"
        tf = max(128, (block_budget // (tn * itemsize)) // 128 * 128)
        tf = min(tf, _round_up(feat_e, 128))
        # Grid: lane tiles OUTER, row tiles INNER, so the parameter block index
        # only changes on the outer axis (no re-fetch across the inner loop).
        # Ragged edges handled by Pallas via cdiv grid + masked partial blocks.
        grid = (-(-feat_e // tf), -(-rows // tn))
        in_specs = [
            pl.BlockSpec(memory_space=pltpu.MemorySpace.SMEM),
            pl.BlockSpec((tn, tf), lambda j, i: (i, j)),
            pl.BlockSpec((p_rows, tf), lambda j, i: (0, j)),
        ]
        out_specs = pl.BlockSpec((tn, tf), lambda j, i: (i, j))
        dim_sems = ("parallel", "parallel")

    cost = pl.CostEstimate(
        flops=2 * n * feat,
        transcendentals=0,
        bytes_accessed=(2 * n * feat + feat) * itemsize,
    )
    strength_arr = jnp.asarray(strength, dtype=jnp.float32).reshape(1)

    out2 = pl.pallas_call(
        _shift_kernel,
        out_shape=jax.ShapeDtypeStruct((rows, feat_e), x.dtype),
        grid_spec=pl.GridSpec(grid=grid, in_specs=in_specs, out_specs=out_specs),
        compiler_params=pltpu.CompilerParams(
            dimension_semantics=dim_sems,
            vmem_limit_bytes=vmem_limit,
        ),
        cost_estimate=cost,
    )(strength_arr, x2, p2)

    # Output has the exact logical element count -> free reshape back, no slice.
    return out2.reshape((n,) + shape)


if __name__ == "__main__":
    key = jax.random.PRNGKey(0)
    kx, kp = jax.random.split(key)

    # Small shapes consistent with the module: shape = (C, H, W) = (4, 16, 16)
    N, C, H, W = 2, 4, 16, 16
    strength = 0.1

    x = jax.random.normal(kx, (N, C, H, W), dtype=jnp.float32)
    # Deterministic "torch.randn(1, *shape)" analogue:
    parameter = jax.random.normal(kp, (1, C, H, W), dtype=jnp.float32)

    out = data_shift_adversary(x, parameter, strength)
    out = jax.block_until_ready(out)

    # Reference check in plain JAX (same semantics as the PyTorch forward).
    ref = x + strength * parameter
    assert out.shape == x.shape and out.dtype == x.dtype
    assert jnp.allclose(out, ref, atol=1e-6, rtol=1e-6)

    print("KERNEL_OK")
</pallas_src>

<mosaic_0001>
module attributes {stable_mosaic.version = 11 : i64} {
  func.func @_shift_kernel(%arg0: i32, %arg1: memref<1xf32, #tpu.memory_space<smem>>, %arg2: memref<8x128xf32, #tpu.memory_space<vmem>>, %arg3: memref<8x128xf32, #tpu.memory_space<vmem>>, %arg4: memref<8x128xf32, #tpu.memory_space<vmem>>) attributes {dimension_semantics = [#tpu.dimension_semantics<parallel>], iteration_bounds = array<i64: 2>, scalar_prefetch = 0 : i64, scratch_operands = 0 : i64, tpu.core_type = #tpu.core_type<tc>, window_params = [{transform_indices = @transform_0, window_bounds = array<i64: 1>}, {transform_indices = @transform_1, window_bounds = array<i64: 8, 128>}, {pipeline_mode = #tpu.pipeline_mode<synchronous>, transform_indices = @transform_2, window_bounds = array<i64: 8, 128>}, {transform_indices = @transform_3, window_bounds = array<i64: 8, 128>}]} {
    %c0 = arith.constant 0 : index
    %c0_0 = arith.constant 0 : index
    %0 = vector.load %arg2[%c0, %c0_0] : memref<8x128xf32, #tpu.memory_space<vmem>>, vector<8x128xf32>
    %c0_1 = arith.constant 0 : index
    %1 = memref.load %arg1[%c0_1] : memref<1xf32, #tpu.memory_space<smem>>
    %c0_2 = arith.constant 0 : index
    %c0_3 = arith.constant 0 : index
    %2 = vector.load %arg3[%c0_2, %c0_3] : memref<8x128xf32, #tpu.memory_space<vmem>>, vector<8x128xf32>
    %3 = vector.broadcast %1 : f32 to vector<8x128xf32>
    %4 = arith.mulf %3, %2 : vector<8x128xf32>
    %5 = arith.addf %0, %4 : vector<8x128xf32>
    %c0_4 = arith.constant 0 : index
    %c0_5 = arith.constant 0 : index
    %6 = vector.load %arg4[%c0_4, %c0_5] : memref<8x128xf32, #tpu.memory_space<vmem>>, vector<8x128xf32>
    tpu.vector_store %arg4[%c0_4, %c0_5], %5 {strides = array<i32>} : memref<8x128xf32, #tpu.memory_space<vmem>>, vector<8x128xf32>,
    return
  }
  func.func @transform_0(%arg0: i32) -> i32 {
    %c0_i32 = arith.constant 0 : i32
    %c0_i32_0 = arith.constant 0 : i32
    return %c0_i32 : i32
  }
  func.func @transform_1(%arg0: i32) -> (i32, i32) {
    %c0_i32 = arith.constant 0 : i32
    %c0_i32_0 = arith.constant 0 : i32
    return %arg0, %c0_i32 : i32, i32
  }
  func.func @transform_2(%arg0: i32) -> (i32, i32) {
    %c0_i32 = arith.constant 0 : i32
    %c0_i32_0 = arith.constant 0 : i32
    %c0_i32_1 = arith.constant 0 : i32
    return %c0_i32, %c0_i32_0 : i32, i32
  }
  func.func @transform_3(%arg0: i32) -> (i32, i32) {
    %c0_i32 = arith.constant 0 : i32
    %c0_i32_0 = arith.constant 0 : i32
    return %arg0, %c0_i32 : i32, i32
  }
}

</mosaic_0001>

<bundles_post_ra>
// kernel: tpu_custom_call.1
= control target key start
LH: loop header
LB: loop body
LE: loop exit
PB: predicated region body
PF: predicated region fallthrough
CT: control target
= control target key end

     0   :  { %s672_s0 = inlined_call_operand.<no memory space> [shape: f32[1], index: 0, kind: input, shape index: {}]   ;;  %s673_s1 = inlined_call_operand.hbm [shape: f32[16,128], index: 1, kind: input, shape index: {}]   ;;  %s674_s2 = inlined_call_operand.hbm [shape: f32[8,128], index: 2, kind: input, shape index: {}]   ;;  %s675_s3 = inlined_call_operand.hbm [shape: f32[16,128], index: 3, kind: output, shape index: {}]  }
   0x1   :  { %8 = sst [smem:[#allocation2]] %s672_s0 }
   0x2   :  { %9 = vsyncpa [#allocation4], 0 }
   0x3   :  { %11 = vsyncpa [#allocation4 + $0x1], 0 }
   0x4   :  { %12 = vsyncpa [#allocation7], 0 }
   0x5   :  { %13 = vsyncpa [#allocation5], 0 }
   0x6   :  { %15 = vsyncpa [#allocation5 + $0x1], 0  ;;  %s534_s14 = smov 0   ;;  %s536_s15 = smov 0  }
   0x7   :  { %s538_s16 = smov 0   ;;  %s540_s17 = smov 0  }
   0x8 LB: > { %s555_s0 = sadd.s32 4294967295, %s508_s17   ;;  %s307_s18 = sadd.s32 4294967294, %s508_s17   ;;  %s508_s17 = sphi %s540_s17, %s685_s17   ;;  %s504_s16 = sphi %s538_s16, %s684_s16   ;;  %s500_s15 = sphi %s536_s15, %s683_s15   ;;  %s496_s14 = sphi %s534_s14, %s682_s14  }
   0x9   : > { %p62_p0 = scmp.ne.s32.totalorder %s500_s15, %s496_s14  ;;  %p63_p1 = scmp.eq.s32.totalorder %s555_s0, 0 }
   0xa   : > { %p107_p2 = scmp.eq.s32.totalorder %s555_s0, 1  ;;  %p113_p3 = scmp.eq.s32.totalorder %s307_s18, 1 }
   0xb   : > { %p564_p4 = por %p63_p1, %p62_p0  ;;  %p308_p5 = scmp.ge.s32.totalorder %s508_s17, 1 }
   0xc   : > { %p569_p6 = por %p113_p3, %p62_p0  ;;  %p120_p7 = scmp.lt.s32.totalorder %s508_s17, 3 }
   0xd   : > { %s135_s23 = sshll.u32 %s674_s2, 4  ;;  %s510_s25 = smov [#allocation6]   ;;  %s136_s23 = int_to_ptr.hbm [resolvable:$true] %s135_s23 }
   0xe   : > { %p577_p8 = pnand %p308_p5, %p120_p7  ;;  %s137_s26 = sshll.u32 %s510_s25, 4  ;;  %s138_s26 = int_to_ptr.vmem [resolvable:$true] %s137_s26 }
   0xf   : > { %s587_s27 = sadd.s32 1, %s508_s17   ;;  %s49_s28 = sadd.s32 1, %s504_s16 }
  0x10   : > { %p329_p10 = pneg %p577_p8  ;;  %s46_s29 = ssub.s32 %s508_s17, %s587_s27 }
  0x11   : > { %p47_p12 = scmp.eq.s32.totalorder %s46_s29, 0  ;;  %p56_p13 = scmp.ne.s32.totalorder %s504_s16, %s500_s15 }
  0x12   : > { %p330_p11 = pnand %p329_p10, %p63_p1  ;;  %p57_p0 = scmp.eq.s32.totalorder %s508_s17, 0 }
  0x13   : > { %s596_s30 = scalar_select %p47_p12, %s504_s16, %s49_s28  }
  0x14   : > { %332 = dma.hbm_to_vmem [thread:$0]  (!%p330_p11), %s136_s23, 128, %s138_s26, [#allocation7]  }
  0x15   : > { %p600_p3 = por %p107_p2, %p56_p13  ;;  %p342_p5 = scmp.lt.s32.totalorder %s508_s17, 2 }
  0x16   : > { %s148_s5 = sand.u32 1, %s504_s16   ;;  %s312_s6 = sshll.u32 %s508_s17, 3 }
  0x17   : > { %p58_p7 = por %p57_p0, %p56_p13  ;;  %s311_s7 = sshll.u32 %s148_s5, 3 }
  0x18   : > { %s156_s10 = scalar_lea.hbm %s673_s1, %s312_s6  ;;  %s152_s12 = scalar_lea.vmem [#allocation3], %s311_s7 }
  0x19   : > { %s158_s11 = sshll.u32 %s156_s10, 4  ;;  %s160_s13 = sshll.u32 %s152_s12, 4  ;;  %s159_s11 = int_to_ptr.hbm [resolvable:$true] %s158_s11  ;;  %s161_s13 = int_to_ptr.vmem [resolvable:$true] %s160_s13 }
  0x1a   : > { %p610_p10 = pnand %p342_p5, %p58_p7  ;;  %s149_s21 = scalar_lea.sflag [#allocation4], %s148_s5 }
  0x1b   : > { %s408_s22 = sshra.s32 %s159_s11, 4  ;;  %s415_s28 = scalar_lea.hbm %s673_s1, 16  ;;  %s409_s22 = int_to_ptr.hbm [resolvable:$true] %s408_s22 }
  0x1c   : > { %s410_s23 = scalar_lea.hbm %s409_s22, 8  ;;  %p412_p11 = pneg %p610_p10 }
  0x1d   : > { %p411_p2 = scmp.ne.s32.totalorder %s409_s22, %s410_s23  ;;  %p416_p0 = scmp.lt.s32.totalorder %s409_s22, %s673_s1 }
  0x1e   : > { %p417_p5 = scmp.lt.s32.totalorder %s415_s28, %s410_s23 }
  0x1f   : > { %p413_p12 = pnand %p412_p11, %p411_p2 }
  0x20   : > { %p418_p7 = por %p417_p5, %p416_p0 }
  0x21   : > { %p414_p13 = pneg %p413_p12 }
  0x23   : > { %p419_p9 = pnand %p418_p7, %p414_p13 }
  0x25   : > { %422 = shalt.err (!%p419_p9)
}
  0x26   : > { %336 = dma.hbm_to_vmem [thread:$0]  (!%p610_p10), %s159_s11, 128, %s161_s13, %s149_s21  }
  0x27   : > { %169 = sbr.rel (%p577_p8) target bundleno = 62 (0x3e), region = 32  ;;  %s627_s5 = sand.u32 (!%p577_p8), 1, %s500_s15  }
  0x28   : > { %s314_s7 = sshll.u32 (!%p577_p8), %s627_s5, 3  ;;  %s172_s8 = scalar_lea.sflag (!%p577_p8), [#allocation4], %s627_s5 }
  0x29   : > { %s175_s9 = scalar_lea.vmem (!%p577_p8), [#allocation3], %s314_s7 }
  0x2c   : > { %483 = dma.done.wait (%p564_p4), %s172_s8, 128  }
  0x2d   : > { %485 = vsyncadd (%p564_p4), %s172_s8, 4294967168 }
  0x2e   : > { %487 = dma.done.wait (%p63_p1), [#allocation7], 128  }
  0x2f   : > { %489 = vsyncadd (%p63_p1), [#allocation7], 4294967168  ;;  %s205_s24 = sld [smem:[#allocation2]]  ;;  %s318_s10 = sshll.u32 %s555_s0, 3  ;;  %v204_v0 = vld [vmem:[%s175_s9] sm:$0xff]  ;;  %v206_v1 = vld [vmem:[#allocation6] sm:$0xff] }
  0x30   : > { %s222_s13 = scalar_lea.hbm %s675_s3, %s318_s10  ;;  %s203_s19 = scalar_lea.vmem [#allocation8], %s314_s7 }
  0x31   : > { %s224_s18 = sshll.u32 %s203_s19, 4  ;;  %s226_s21 = sshll.u32 %s222_s13, 4  ;;  %s225_s18 = int_to_ptr.vmem [resolvable:$true] %s224_s18  ;;  %s227_s21 = int_to_ptr.hbm [resolvable:$true] %s226_s21 }
  0x32   : > { %s212_s22 = scalar_lea.sflag [#allocation5], %s627_s5  ;;  %s452_s23 = sshra.s32 %s227_s21, 4  ;;  %s453_s23 = int_to_ptr.hbm [resolvable:$true] %s452_s23 }
  0x33   : > { %s454_s0 = scalar_lea.hbm %s453_s23, 8  ;;  %s458_s28 = scalar_lea.hbm %s675_s3, 16 }
  0x34   : > { %p455_p1 = scmp.ne.s32.totalorder %s453_s23, %s454_s0  ;;  %p459_p9 = scmp.lt.s32.totalorder %s453_s23, %s675_s3 }
  0x35   : > { %v207_v2 = vstv %s205_s24  ;;  %p460_p10 = scmp.lt.s32.totalorder %s458_s28, %s454_s0 }
  0x36   : > { %v208_v3 = vmul.f32 %v207_v2, %v206_v1  ;;  %p456_p4 = pnand %p455_p1, %p600_p3 }
  0x37   : > { %p461_p2 = por %p460_p10, %p459_p9 }
  0x38   : > { %v209_v4 = vadd.f32 %v208_v3, %v204_v0  ;;  %p457_p8 = pneg %p456_p4 }
  0x3a   : > { %210 = vst [vmem:[%s203_s19] sm:$0xff] %v209_v4  ;;  %p462_p11 = pnand %p461_p2, %p457_p8 }
  0x3c   : > { %465 = shalt.err (!%p462_p11)
}
  0x3d   : > { %327 = dma.vmem_to_hbm [thread:$0]  (%p600_p3), %s225_s18, 128, %s227_s21, %s212_s22  }
  0x3e PF: > { %s238_s5 = sand.u32 1, %s496_s14   ;;  %p681_p12 = scmp.ge.s32.totalorder %s508_s17, 2 }
  0x3f   : > { %s239_s7 = scalar_lea.sflag [#allocation5], %s238_s5 }
  0x40   : > { %p338_p13 = pnand %p681_p12, %p569_p6 }
  0x42   : > { %p339_p0 = pneg %p338_p13 }
  0x44   : > { %491 = dma.done.wait (%p339_p0), %s239_s7, 128  }
  0x45   : > { %493 = vsyncadd (%p339_p0), %s239_s7, 4294967168  ;;  %p18_p5 = scmp.ge.s32.totalorder %s587_s27, 4   ;;  %s682_s14 = smov %s500_s15 }
  0x46   : > { %s683_s15 = smov %s504_s16  ;;  %s684_s16 = smov %s596_s30 }
  0x47   : > { %s685_s17 = smov %s587_s27  ;;  %20 = sbr.rel (!%p18_p5) target bundleno = 8 (0x8), region = 81 }
  0x4c   :  { %245 = vsyncpa [#allocation4], 1 }
  0x4d   :  { %247 = vsyncpa [#allocation4 + $0x1], 1 }
  0x4e   :  { %248 = vsyncpa [#allocation7], 1 }
  0x4f   :  { %249 = vsyncpa [#allocation5], 1 }
  0x50   :  { %251 = vsyncpa [#allocation5 + $0x1], 1 }

</bundles_post_ra>
